<compile_context>
chip_gen: v7x
topology: tpu7x:2x2x1
jax: 0.10.0
libtpu: 0.0.40
codegen_flags: <defaults>
</compile_context>

<pallas_src>
import jax
import jax.numpy as jnp
from jax.experimental import pallas as pl
from jax.experimental.pallas import tpu as pltpu

EPS = 1e-5
N_OUT = 2            # real number of logits
OUT_PAD = 8          # compact padded head width stored to HBM (block == array dim)
MIN_SPLIT_ROWS = 512 # don't split tiny batches just to manufacture grid steps


def _round_up(n, m):
    return ((n + m - 1) // m) * m


def _mish(x):
    # Single-transcendental Mish:
    #   mish(x) = x * tanh(softplus(x)) = x * t / (t + 2),  t = e^x (e^x + 2)
    # Clamp before exp so t stays finite; for x >= 20, tanh(softplus(x)) == 1
    # to f32 precision, so the clamp is exact.
    e = jnp.exp(jnp.minimum(x, 20.0))
    t = e * (e + 2.0)
    return x * (t / (t + 2.0))


# ----------------------------------------------------------------------------
# Kernel: one batch tile, all (folded) weights resident in VMEM.
# ----------------------------------------------------------------------------
def classifier_kernel(x_ref, w1_ref, b1_ref, w2_ref, b2_ref, w3_ref, b3_ref, o_ref):
    # In-kernel cast to bf16 (free VPU work, overlaps MXU/DMA); input streams
    # from HBM at the caller's dtype so there is no separate pre-cast pass.
    x = x_ref[...].astype(w1_ref.dtype)                                  # (TB, 384)

    # fc1 -> mish          (BN1 is folded into fc2; dropout = identity at eval)
    h1 = jnp.dot(x, w1_ref[...], preferred_element_type=jnp.float32) + b1_ref[...]
    h1 = _mish(h1).astype(w2_ref.dtype)                                  # bf16 for MXU

    # (bn1 ∘ fc2) -> mish  (BN2 is folded into fc_out)
    h2 = jnp.dot(h1, w2_ref[...], preferred_element_type=jnp.float32) + b2_ref[...]
    h2 = _mish(h2).astype(w3_ref.dtype)

    # (bn2 ∘ fc_out), zero-padded from 2 to OUT_PAD columns
    out = jnp.dot(h2, w3_ref[...], preferred_element_type=jnp.float32) + b3_ref[...]
    o_ref[...] = out.astype(o_ref.dtype)


# ----------------------------------------------------------------------------
# Host-side parameter preprocessing: BN folding + head padding + bf16 cast.
# Call ONCE (hoisted out of the forward path) and reuse the result.
# ----------------------------------------------------------------------------
def _fold_bn_into_next_linear(w, b, gamma, beta, mean, var):
    # next_linear(bn(h)) = (h*s + t) @ w + b  with s = gamma*rsqrt(var+eps),
    # t = beta - mean*s  ==>  w' = s[:, None] * w,  b' = t @ w + b
    s = gamma * jax.lax.rsqrt(var + EPS)        # (1, F)
    t = beta - mean * s                         # (1, F)
    return w * s.reshape(-1, 1), b + t @ w


def prepare_params(params, compute_dtype=jnp.bfloat16):
    w2f, b2f = _fold_bn_into_next_linear(
        params["w2"], params["b2"],
        params["g1"], params["be1"], params["m1"], params["v1"])
    w3f, b3f = _fold_bn_into_next_linear(
        params["w3"], params["b3"],
        params["g2"], params["be2"], params["m2"], params["v2"])

    # Pad the 2-wide head to OUT_PAD columns (extra columns are exactly zero).
    w3p = jnp.zeros((w3f.shape[0], OUT_PAD), jnp.float32).at[:, :N_OUT].set(w3f)
    b3p = jnp.zeros((1, OUT_PAD), jnp.float32).at[:, :N_OUT].set(b3f)

    return dict(
        w1=params["w1"].astype(compute_dtype), b1=params["b1"],
        w2=w2f.astype(compute_dtype),          b2=b2f,
        w3=w3p.astype(compute_dtype),          b3=b3p,
    )


# ----------------------------------------------------------------------------
# Wrapper
# ----------------------------------------------------------------------------
def _pick_batch_tile(B, batch_tile):
    tb = min(_round_up(batch_tile, 8), _round_up(max(B, 8), 8))
    # Keep >= 2 (preferably 4) grid steps on large batches so
    # dimension_semantics=("parallel",) can shard across megacore / v7x's 2 TCs.
    for min_tiles in (4, 2):
        if B >= min_tiles * MIN_SPLIT_ROWS:
            tb = min(tb, _round_up(pl.cdiv(B, min_tiles), 8))
            break
    return max(tb, 8)


def custom_classifier_forward(x, prepared, *, batch_tile=2048, x_buffer_count=2):
    """Forward pass. `prepared` must come from prepare_params() (hoisted)."""
    B, D_in = x.shape
    fp = prepared

    tb = _pick_batch_tile(B, batch_tile)
    n_tiles = pl.cdiv(B, tb)          # ragged last tile is OOB-masked by Pallas

    def const_spec(a):
        nd = a.ndim
        return pl.BlockSpec(a.shape, lambda i, _nd=nd: (0,) * _nd)

    # Optional deeper prefetch on the only streamed operand (off by default).
    x_spec_kwargs = {}
    if x_buffer_count and x_buffer_count > 2:
        x_spec_kwargs["pipeline_mode"] = pl.Buffered(x_buffer_count)
    x_spec = pl.BlockSpec((tb, D_in), lambda i: (i, 0), **x_spec_kwargs)

    n_weight_bytes = sum(int(v.size) * v.dtype.itemsize for v in fp.values())
    cost = pl.CostEstimate(
        flops=2 * B * (384 * 256 + 256 * 128 + 128 * OUT_PAD),
        transcendentals=B * (256 + 128),                 # one exp per Mish elem
        bytes_accessed=(B * D_in * x.dtype.itemsize
                        + n_weight_bytes
                        + B * OUT_PAD * 4),
    )

    # VMEM budget: x double/triple buffers + out buffers + resident weights
    # + f32 intermediates, with headroom; clamped so it is safe on v7x (64 MiB
    # physical) while still above the default scoped limit on v5e/v6e.
    x_tile_bytes = tb * D_in * x.dtype.itemsize
    vmem_est = (max(2, x_buffer_count) * x_tile_bytes
                + 2 * tb * OUT_PAD * 4
                + 2 * n_weight_bytes
                + 6 * tb * 256 * 4)
    vmem_limit = int(min(64 * 1024 * 1024, max(32 * 1024 * 1024, vmem_est)))

    out = pl.pallas_call(
        classifier_kernel,
        out_shape=jax.ShapeDtypeStruct((B, OUT_PAD), jnp.float32),
        grid_spec=pltpu.PrefetchScalarGridSpec(
            num_scalar_prefetch=0,
            grid=(n_tiles,),
            in_specs=[
                x_spec,                                       # streamed x tile
                const_spec(fp["w1"]), const_spec(fp["b1"]),   # resident weights
                const_spec(fp["w2"]), const_spec(fp["b2"]),
                const_spec(fp["w3"]), const_spec(fp["b3"]),
            ],
            out_specs=pl.BlockSpec((tb, OUT_PAD), lambda i: (i, 0)),
        ),
        compiler_params=pltpu.CompilerParams(
            dimension_semantics=("parallel",),                # megacore / v7x 2-TC
            vmem_limit_bytes=vmem_limit,
        ),
        cost_estimate=cost,
    )(x, fp["w1"], fp["b1"], fp["w2"], fp["b2"], fp["w3"], fp["b3"])

    return out[:, :N_OUT]     # tiny (B, 8) -> (B, 2) slice; fuses under jit


# ----------------------------------------------------------------------------
# Params + references
# ----------------------------------------------------------------------------
def init_params(key):
    ks = jax.random.split(key, 16)

    def lin(kw, kb, fan_in, fan_out):
        bound = 1.0 / jnp.sqrt(fan_in)
        w = jax.random.uniform(kw, (fan_in, fan_out), jnp.float32, -bound, bound)
        b = jax.random.uniform(kb, (1, fan_out), jnp.float32, -bound, bound)
        return w, b

    w1, b1 = lin(ks[0], ks[1], 384, 256)
    w2, b2 = lin(ks[2], ks[3], 256, 128)
    w3, b3 = lin(ks[4], ks[5], 128, 2)

    def bn(kg, kb, km, kv, f):
        g = 1.0 + 0.1 * jax.random.normal(kg, (1, f), jnp.float32)
        be = 0.1 * jax.random.normal(kb, (1, f), jnp.float32)
        m = 0.1 * jax.random.normal(km, (1, f), jnp.float32)
        v = 1.0 + 0.1 * jax.random.uniform(kv, (1, f), jnp.float32)
        return g, be, m, v

    g1, be1, m1, v1 = bn(ks[6], ks[7], ks[8], ks[9], 256)
    g2, be2, m2, v2 = bn(ks[10], ks[11], ks[12], ks[13], 128)

    return dict(
        w1=w1, b1=b1, g1=g1, be1=be1, m1=m1, v1=v1,
        w2=w2, b2=b2, g2=g2, be2=be2, m2=m2, v2=v2,
        w3=w3, b3=b3,
    )


def _reference_forward_f32(x, p):
    """Pure f32 reference of the original module (eval mode)."""
    def mish(z):
        return z * jnp.tanh(jnp.maximum(z, 0.0) + jnp.log1p(jnp.exp(-jnp.abs(z))))

    def bn(z, g, b, m, v):
        return (z - m) * jax.lax.rsqrt(v + EPS) * g + b

    h = bn(mish(x @ p["w1"] + p["b1"]), p["g1"], p["be1"], p["m1"], p["v1"])
    h = bn(mish(h @ p["w2"] + p["b2"]), p["g2"], p["be2"], p["m2"], p["v2"])
    return h @ p["w3"] + p["b3"]


def _reference_forward_matched(x, prepared):
    """Same math as the kernel (folded BN, bf16-rounded weights/activations)."""
    fp = prepared
    f32 = lambda a: a.astype(jnp.float32)
    xb = f32(x.astype(fp["w1"].dtype))
    h1 = _mish(xb @ f32(fp["w1"]) + fp["b1"])
    h1 = f32(h1.astype(fp["w2"].dtype))
    h2 = _mish(h1 @ f32(fp["w2"]) + fp["b2"])
    h2 = f32(h2.astype(fp["w3"].dtype))
    out = h2 @ f32(fp["w3"]) + fp["b3"]
    return out[:, :N_OUT]


if __name__ == "__main__":
    key = jax.random.PRNGKey(0)
    kx, kp = jax.random.split(key)
    B = 8
    x = jax.random.normal(kx, (B, 384), jnp.float32)
    params = init_params(kp)

    # Hoisted parameter prep: BN folding + head padding + bf16 cast, done once.
    prepared = jax.tree_util.tree_map(jax.block_until_ready,
                                      prepare_params(params))

    fwd = jax.jit(custom_classifier_forward,
                  static_argnames=("batch_tile", "x_buffer_count"))
    out = fwd(x, prepared)
    out = jax.block_until_ready(out)
    assert out.shape == (B, N_OUT)

    # Bit-level math check (same folded/bf16 computation as the kernel).
    ref_matched = _reference_forward_matched(x, prepared)
    assert jnp.allclose(out, ref_matched, atol=5e-3, rtol=5e-3), (
        "mismatch vs matched reference")

    # Semantics check vs the original f32 eval-mode module (loose: bf16 cast).
    ref_f32 = _reference_forward_f32(x, params)
    max_err = float(jnp.max(jnp.abs(out - ref_f32)))
    assert max_err < 1e-1, f"mismatch vs f32 reference (max abs err {max_err})"

    print("KERNEL_OK")
</pallas_src>

<mosaic_0001>
module attributes {stable_mosaic.version = 11 : i64} {
  func.func @classifier_kernel(%arg0: i32, %arg1: memref<8x384xf32, #tpu.memory_space<vmem>>, %arg2: memref<384x256xbf16, #tpu.memory_space<vmem>>, %arg3: memref<1x256xf32, #tpu.memory_space<vmem>>, %arg4: memref<256x128xbf16, #tpu.memory_space<vmem>>, %arg5: memref<1x128xf32, #tpu.memory_space<vmem>>, %arg6: memref<128x8xbf16, #tpu.memory_space<vmem>>, %arg7: memref<1x8xf32, #tpu.memory_space<vmem>>, %arg8: memref<8x8xf32, #tpu.memory_space<vmem>>) attributes {dimension_semantics = [#tpu.dimension_semantics<parallel>], iteration_bounds = array<i64: 1>, scalar_prefetch = 0 : i64, scratch_operands = 0 : i64, tpu.core_type = #tpu.core_type<tc>, window_params = [{transform_indices = @transform_0, window_bounds = array<i64: 8, 384>}, {pipeline_mode = #tpu.pipeline_mode<synchronous>, transform_indices = @transform_1, window_bounds = array<i64: 384, 256>}, {pipeline_mode = #tpu.pipeline_mode<synchronous>, transform_indices = @transform_2, window_bounds = array<i64: 1, 256>}, {pipeline_mode = #tpu.pipeline_mode<synchronous>, transform_indices = @transform_3, window_bounds = array<i64: 256, 128>}, {pipeline_mode = #tpu.pipeline_mode<synchronous>, transform_indices = @transform_4, window_bounds = array<i64: 1, 128>}, {pipeline_mode = #tpu.pipeline_mode<synchronous>, transform_indices = @transform_5, window_bounds = array<i64: 128, 8>}, {pipeline_mode = #tpu.pipeline_mode<synchronous>, transform_indices = @transform_6, window_bounds = array<i64: 1, 8>}, {transform_indices = @transform_7, window_bounds = array<i64: 8, 8>}]} {
    %c0 = arith.constant 0 : index
    %c0_0 = arith.constant 0 : index
    %0 = vector.load %arg1[%c0, %c0_0] : memref<8x384xf32, #tpu.memory_space<vmem>>, vector<8x384xf32>
    %1 = arith.truncf %0 : vector<8x384xf32> to vector<8x384xbf16>
    %c0_1 = arith.constant 0 : index
    %c0_2 = arith.constant 0 : index
    %2 = vector.load %arg2[%c0_1, %c0_2] : memref<384x256xbf16, #tpu.memory_space<vmem>>, vector<384x256xbf16>
    %cst = arith.constant dense<0.000000e+00> : vector<8x256xf32>
    %3 = tpu.matmul %1, %2, %cst {dimension_numbers = #tpu.dot_dimension_numbers<[1], [0], [0], [1], [0, 0, 1, 1], [], []>} : vector<8x384xbf16>, vector<384x256xbf16>, vector<8x256xf32> -> vector<8x256xf32>
    %c0_3 = arith.constant 0 : index
    %c0_4 = arith.constant 0 : index
    %4 = vector.load %arg3[%c0_3, %c0_4] : memref<1x256xf32, #tpu.memory_space<vmem>>, vector<1x256xf32>
    %5 = vector.broadcast %4 : vector<1x256xf32> to vector<8x256xf32>
    %6 = arith.addf %3, %5 : vector<8x256xf32>
    %cst_5 = arith.constant 2.000000e+01 : f32
    %7 = vector.broadcast %cst_5 : f32 to vector<8x256xf32>
    %8 = arith.minimumf %6, %7 : vector<8x256xf32>
    %9 = math.exp %8 : vector<8x256xf32>
    %cst_6 = arith.constant 2.000000e+00 : f32
    %10 = vector.broadcast %cst_6 : f32 to vector<8x256xf32>
    %11 = arith.addf %9, %10 : vector<8x256xf32>
    %12 = arith.mulf %9, %11 : vector<8x256xf32>
    %cst_7 = arith.constant 2.000000e+00 : f32
    %13 = vector.broadcast %cst_7 : f32 to vector<8x256xf32>
    %14 = arith.addf %12, %13 : vector<8x256xf32>
    %15 = arith.divf %12, %14 : vector<8x256xf32>
    %16 = arith.mulf %6, %15 : vector<8x256xf32>
    %17 = arith.truncf %16 : vector<8x256xf32> to vector<8x256xbf16>
    %c0_8 = arith.constant 0 : index
    %c0_9 = arith.constant 0 : index
    %18 = vector.load %arg4[%c0_8, %c0_9] : memref<256x128xbf16, #tpu.memory_space<vmem>>, vector<256x128xbf16>
    %cst_10 = arith.constant dense<0.000000e+00> : vector<8x128xf32>
    %19 = tpu.matmul %17, %18, %cst_10 {dimension_numbers = #tpu.dot_dimension_numbers<[1], [0], [0], [1], [0, 0, 1, 1], [], []>} : vector<8x256xbf16>, vector<256x128xbf16>, vector<8x128xf32> -> vector<8x128xf32>
    %c0_11 = arith.constant 0 : index
    %c0_12 = arith.constant 0 : index
    %20 = vector.load %arg5[%c0_11, %c0_12] : memref<1x128xf32, #tpu.memory_space<vmem>>, vector<1x128xf32>
    %21 = vector.broadcast %20 : vector<1x128xf32> to vector<8x128xf32>
    %22 = arith.addf %19, %21 : vector<8x128xf32>
    %cst_13 = arith.constant 2.000000e+01 : f32
    %23 = vector.broadcast %cst_13 : f32 to vector<8x128xf32>
    %24 = arith.minimumf %22, %23 : vector<8x128xf32>
    %25 = math.exp %24 : vector<8x128xf32>
    %cst_14 = arith.constant 2.000000e+00 : f32
    %26 = vector.broadcast %cst_14 : f32 to vector<8x128xf32>
    %27 = arith.addf %25, %26 : vector<8x128xf32>
    %28 = arith.mulf %25, %27 : vector<8x128xf32>
    %cst_15 = arith.constant 2.000000e+00 : f32
    %29 = vector.broadcast %cst_15 : f32 to vector<8x128xf32>
    %30 = arith.addf %28, %29 : vector<8x128xf32>
    %31 = arith.divf %28, %30 : vector<8x128xf32>
    %32 = arith.mulf %22, %31 : vector<8x128xf32>
    %33 = arith.truncf %32 : vector<8x128xf32> to vector<8x128xbf16>
    %c0_16 = arith.constant 0 : index
    %c0_17 = arith.constant 0 : index
    %34 = vector.load %arg6[%c0_16, %c0_17] : memref<128x8xbf16, #tpu.memory_space<vmem>>, vector<128x8xbf16>
    %cst_18 = arith.constant dense<0.000000e+00> : vector<8x8xf32>
    %35 = tpu.matmul %33, %34, %cst_18 {dimension_numbers = #tpu.dot_dimension_numbers<[1], [0], [0], [1], [0, 0, 1, 1], [], []>} : vector<8x128xbf16>, vector<128x8xbf16>, vector<8x8xf32> -> vector<8x8xf32>
    %c0_19 = arith.constant 0 : index
    %c0_20 = arith.constant 0 : index
    %36 = vector.load %arg7[%c0_19, %c0_20] : memref<1x8xf32, #tpu.memory_space<vmem>>, vector<1x8xf32>
    %37 = vector.broadcast %36 : vector<1x8xf32> to vector<8x8xf32>
    %38 = arith.addf %35, %37 : vector<8x8xf32>
    %c0_21 = arith.constant 0 : index
    %c0_22 = arith.constant 0 : index
    %39 = vector.load %arg8[%c0_21, %c0_22] : memref<8x8xf32, #tpu.memory_space<vmem>>, vector<8x8xf32>
    tpu.vector_store %arg8[%c0_21, %c0_22], %38 {strides = array<i32>} : memref<8x8xf32, #tpu.memory_space<vmem>>, vector<8x8xf32>,
    return
  }
  func.func @transform_0(%arg0: i32) -> (i32, i32) {
    %c0_i32 = arith.constant 0 : i32
    %c0_i32_0 = arith.constant 0 : i32
    return %arg0, %c0_i32 : i32, i32
  }
  func.func @transform_1(%arg0: i32) -> (i32, i32) {
    %c0_i32 = arith.constant 0 : i32
    %c0_i32_0 = arith.constant 0 : i32
    %c0_i32_1 = arith.constant 0 : i32
    return %c0_i32, %c0_i32_0 : i32, i32
  }
  func.func @transform_2(%arg0: i32) -> (i32, i32) {
    %c0_i32 = arith.constant 0 : i32
    %c0_i32_0 = arith.constant 0 : i32
    %c0_i32_1 = arith.constant 0 : i32
    return %c0_i32, %c0_i32_0 : i32, i32
  }
  func.func @transform_3(%arg0: i32) -> (i32, i32) {
    %c0_i32 = arith.constant 0 : i32
    %c0_i32_0 = arith.constant 0 : i32
    %c0_i32_1 = arith.constant 0 : i32
    return %c0_i32, %c0_i32_0 : i32, i32
  }
  func.func @transform_4(%arg0: i32) -> (i32, i32) {
    %c0_i32 = arith.constant 0 : i32
    %c0_i32_0 = arith.constant 0 : i32
    %c0_i32_1 = arith.constant 0 : i32
    return %c0_i32, %c0_i32_0 : i32, i32
  }
  func.func @transform_5(%arg0: i32) -> (i32, i32) {
    %c0_i32 = arith.constant 0 : i32
    %c0_i32_0 = arith.constant 0 : i32
    %c0_i32_1 = arith.constant 0 : i32
    return %c0_i32, %c0_i32_0 : i32, i32
  }
  func.func @transform_6(%arg0: i32) -> (i32, i32) {
    %c0_i32 = arith.constant 0 : i32
    %c0_i32_0 = arith.constant 0 : i32
    %c0_i32_1 = arith.constant 0 : i32
    return %c0_i32, %c0_i32_0 : i32, i32
  }
  func.func @transform_7(%arg0: i32) -> (i32, i32) {
    %c0_i32 = arith.constant 0 : i32
    %c0_i32_0 = arith.constant 0 : i32
    return %arg0, %c0_i32 : i32, i32
  }
}

</mosaic_0001>

<bundles_post_ra>
// kernel: custom_classifier_forward.1
= control target key start
LH: loop header
LB: loop body
LE: loop exit
PB: predicated region body
PF: predicated region fallthrough
CT: control target
= control target key end

     0   :  { %12 = vsyncpa [#allocation3], 0  ;;  %s1181_s0 = inlined_call_operand.vmem [shape: f32[8,384], index: 0, kind: input, shape index: {}]   ;;  %s1182_s1 = inlined_call_operand.hbm [shape: bf16[384,256], index: 1, kind: input, shape index: {}]   ;;  %s1183_s2 = inlined_call_operand.vmem [shape: f32[1,256], index: 2, kind: input, shape index: {}]   ;;  %s1184_s3 = inlined_call_operand.hbm [shape: bf16[256,128], index: 3, kind: input, shape index: {}]   ;;  %s1185_s4 = inlined_call_operand.vmem [shape: f32[1,128], index: 4, kind: input, shape index: {}]   ;;  %s1186_s5 = inlined_call_operand.vmem [shape: bf16[128,8], index: 5, kind: input, shape index: {}]   ;;  %s1187_s6 = inlined_call_operand.vmem [shape: f32[1,8], index: 6, kind: input, shape index: {}]   ;;  %s1188_s7 = inlined_call_operand.vmem [shape: f32[8,8], index: 7, kind: output, shape index: {}]  }
   0x1   :  { %13 = vsyncpa [#allocation5], 0  ;;  %s1063_s24 = smov [#allocation2]   ;;  %s1015_s28 = scalar_lea.hbm %s1182_s1, 6144 }
   0x2   :  { %s21_s25 = sshll.u32 %s1063_s24, 4  ;;  %p1016_p0 = scmp.ne.s32.totalorder %s1182_s1, %s1015_s28  ;;  %s22_s25 = int_to_ptr.vmem [resolvable:$true] %s21_s25 }
   0x3   :  { %p1019_p1 = scmp.lt.u32.totalorder %s1015_s28, %s1182_s1 }
   0x5   :  { %p1021_p2 = pnand %p1019_p1, %p1016_p0 }
   0x7   :  { %1024 = shalt.err (!%p1021_p2)
}
   0x8   :  { %s1025_s10 = scalar_lea.vmem %s22_s25, 6144  ;;  %p1030_p4 = scmp.lt.s32.totalorder %s22_s25, %s22_s25 }
   0x9   :  { %p1026_p3 = scmp.ne.s32.totalorder %s22_s25, %s1025_s10  ;;  %p1031_p5 = scmp.lt.s32.totalorder %s1025_s10, %s1025_s10 }
   0xb   :  { %p1032_p6 = por %p1031_p5, %p1030_p4 }
   0xd   :  { %p1033_p7 = pnand %p1032_p6, %p1026_p3 }
   0xf   :  { %1036 = shalt.err (!%p1033_p7)
}
  0x10   :  { %s1064_s11 = smov 128   ;;  %s1065_s12 = smov 8  }
  0x11   :  { %27 = dma.hbm_to_vmem [thread:$0]  %s1182_s1, 6144, %s22_s25, [#allocation3], %s1064_s11, %s1064_s11, %s1065_s12  }
  0x12   :  { %s1066_s15 = smov [#allocation4]   ;;  %s1037_s19 = scalar_lea.hbm %s1184_s3, 2048 }
  0x13   :  { %s35_s16 = sshll.u32 %s1066_s15, 4  ;;  %p1038_p8 = scmp.ne.s32.totalorder %s1184_s3, %s1037_s19  ;;  %s36_s16 = int_to_ptr.vmem [resolvable:$true] %s35_s16 }
  0x14   :  { %p1041_p9 = scmp.lt.u32.totalorder %s1037_s19, %s1184_s3 }
  0x16   :  { %p1043_p10 = pnand %p1041_p9, %p1038_p8 }
  0x18   :  { %1046 = shalt.err (!%p1043_p10)
}
  0x19   :  { %s1047_s24 = scalar_lea.vmem %s36_s16, 2048  ;;  %p1052_p12 = scmp.lt.s32.totalorder %s36_s16, %s36_s16 }
  0x1a   :  { %p1048_p11 = scmp.ne.s32.totalorder %s36_s16, %s1047_s24  ;;  %p1053_p13 = scmp.lt.s32.totalorder %s1047_s24, %s1047_s24 }
  0x1c   :  { %p1054_p0 = por %p1053_p13, %p1052_p12 }
  0x1e   :  { %p1055_p1 = pnand %p1054_p0, %p1048_p11 }
  0x20   :  { %1058 = shalt.err (!%p1055_p1)
}
  0x21   :  { %s1067_s1 = smov 64   ;;  %s1068_s25 = smov 4  }
  0x22   :  { %41 = dma.hbm_to_vmem [thread:$0]  %s1184_s3, 2048, %s36_s16, [#allocation5], %s1067_s1, %s1067_s1, %s1068_s25  }
  0x23   :  { %1059 = dma.done.wait [#allocation3], 6144  }
  0x24   :  { %1060 = vsyncadd [#allocation3], 4294961152 }
  0x25   :  { %1061 = dma.done.wait [#allocation5], 2048  }
  0x26   :  { %1062 = vsyncadd [#allocation5], 4294965248  ;;  %v907_v0 = vld [vmem:[#allocation2 + $0x4] ss:$8 sps:$4 sm:$0xff]   ;;  %v909_v1 = vld [vmem:[#allocation2] ss:$8 sps:$4 sm:$0xff]  }
  0x27   :  { %361 = vmatprep.subr.bf16.mxu0 %v907_v0  ;;  %v910_v2 = vld [vmem:[#allocation2 + $0x14] ss:$8 sps:$4 sm:$0xff]   ;;  %v912_v3 = vld [vmem:[#allocation2 + $0x10] ss:$8 sps:$4 sm:$0xff]   ;;  %v913_v4 = vld [vmem:[#allocation2 + $0x24] ss:$8 sps:$4 sm:$0xff]  }
  0x28   :  { %362 = vmatpush1.bf16.msra.mxu0 %v909_v1  ;;  %v915_v5 = vld [vmem:[#allocation2 + $0x20] ss:$8 sps:$4 sm:$0xff]   ;;  %v916_v6 = vld [vmem:[#allocation2 + $0x34] ss:$8 sps:$4 sm:$0xff]   ;;  %v918_v7 = vld [vmem:[#allocation2 + $0x30] ss:$8 sps:$4 sm:$0xff]  }
  0x29   :  { %363 = vmatprep.subr.bf16.mxu0 %v910_v2  ;;  %v919_v8 = vld [vmem:[#allocation2 + $0x44] ss:$8 sps:$4 sm:$0xff]   ;;  %v921_v9 = vld [vmem:[#allocation2 + $0x40] ss:$8 sps:$4 sm:$0xff]   ;;  %v922_v10 = vld [vmem:[#allocation2 + $0x54] ss:$8 sps:$4 sm:$0xff]  }
  0x2a   :  { %v924_v11 = vld [vmem:[#allocation2 + $0x50] ss:$8 sps:$4 sm:$0xff]   ;;  %v925_v12 = vld [vmem:[#allocation2 + $0x64] ss:$8 sps:$4 sm:$0xff]   ;;  %v927_v15 = vld [vmem:[#allocation2 + $0x60] ss:$8 sps:$4 sm:$0xff]  }
  0x2b   :  { %v56_v13 = vld [vmem:[%s1181_s0 + $0x8] sm:$0xff]  ;;  %v928_v16 = vld [vmem:[#allocation2 + $0x74] ss:$8 sps:$4 sm:$0xff]   ;;  %v930_v17 = vld [vmem:[#allocation2 + $0x70] ss:$8 sps:$4 sm:$0xff]   ;;  %v1069_v40 = vmov 0  }
  0x2c   :  { %364 = vmatpush1.bf16.msra.mxu0 %v912_v3  ;;  %v59_v14 = vpack.c.bf16 %v56_v13, %v56_v13  ;;  %v931_v18 = vld [vmem:[#allocation2 + $0x84] ss:$8 sps:$4 sm:$0xff]   ;;  %v933_v19 = vld [vmem:[#allocation2 + $0x80] ss:$8 sps:$4 sm:$0xff]   ;;  %v934_v20 = vld [vmem:[#allocation2 + $0x94] ss:$8 sps:$4 sm:$0xff]  }
  0x2d   :  { %365 = vmatprep.subr.bf16.mxu0 %v913_v4  ;;  %v936_v21 = vld [vmem:[#allocation2 + $0x90] ss:$8 sps:$4 sm:$0xff]   ;;  %v937_v22 = vld [vmem:[#allocation2 + $0xa4] ss:$8 sps:$4 sm:$0xff]   ;;  %v939_v23 = vld [vmem:[#allocation2 + $0xa0] ss:$8 sps:$4 sm:$0xff]  }
  0x2e   :  { %393 = vmatprep.mubr.bf16.mxu0 %v59_v14  ;;  %v940_v24 = vld [vmem:[#allocation2 + $0xb4] ss:$8 sps:$4 sm:$0xff]   ;;  %v942_v25 = vld [vmem:[#allocation2 + $0xb0] ss:$8 sps:$4 sm:$0xff]   ;;  %v943_v26 = vld [vmem:[#allocation2 + $0xc4] ss:$8 sps:$4 sm:$0xff]  }
  0x2f   :  { %v945_v27 = vld [vmem:[#allocation2 + $0xc0] ss:$8 sps:$4 sm:$0xff]   ;;  %v946_v28 = vld [vmem:[#allocation2 + $0xd4] ss:$8 sps:$4 sm:$0xff]   ;;  %v948_v29 = vld [vmem:[#allocation2 + $0xd0] ss:$8 sps:$4 sm:$0xff]  }
  0x30   :  { %366 = vmatpush1.bf16.msra.mxu0 %v915_v5  ;;  %v949_v30 = vld [vmem:[#allocation2 + $0xe4] ss:$8 sps:$4 sm:$0xff]   ;;  %v951_v31 = vld [vmem:[#allocation2 + $0xe0] ss:$8 sps:$4 sm:$0xff]   ;;  %v952_v32 = vld [vmem:[#allocation2 + $0xf4] ss:$8 sps:$4 sm:$0xff]  }
  0x31   :  { %367 = vmatprep.subr.bf16.mxu0 %v916_v6  ;;  %v954_v33 = vld [vmem:[#allocation2 + $0xf0] ss:$8 sps:$4 sm:$0xff]   ;;  %v55_v34 = vld [vmem:[%s1181_s0] sm:$0xff]  ;;  %v960_v38 = vld [vmem:[#allocation2 + $0x114] ss:$8 sps:$4 sm:$0xff]   ;;  %vm1071_vm0 = vmmov 0  }
  0x32   :  { %v957_v35 = vld [vmem:[#allocation2 + $0x104] ss:$8 sps:$4 sm:$0xff]   ;;  %v58_v36 = vpack.c.bf16 %v55_v34, %v55_v34  ;;  %v955_v37 = vld [vmem:[#allocation2 + $0x100] ss:$8 sps:$4 sm:$0xff]   ;;  %v958_v39 = vld [vmem:[#allocation2 + $0x110] ss:$8 sps:$4 sm:$0xff]  }
  0x33   :  { %v963_v41 = vld [vmem:[#allocation2 + $0x124] ss:$8 sps:$4 sm:$0xff]   ;;  %v961_v42 = vld [vmem:[#allocation2 + $0x120] ss:$8 sps:$4 sm:$0xff]   ;;  %v966_v43 = vld [vmem:[#allocation2 + $0x134] ss:$8 sps:$4 sm:$0xff]  }
  0x34   :  { %368 = vmatpush1.bf16.msra.mxu0 %v918_v7  ;;  %v964_v44 = vld [vmem:[#allocation2 + $0x130] ss:$8 sps:$4 sm:$0xff]   ;;  %v969_v45 = vld [vmem:[#allocation2 + $0x144] ss:$8 sps:$4 sm:$0xff]   ;;  %v967_v46 = vld [vmem:[#allocation2 + $0x140] ss:$8 sps:$4 sm:$0xff]   ;;  %v111_v7 = vlaneseq }
  0x35   :  { %369 = vmatprep.subr.bf16.mxu0 %v919_v8  ;;  %v972_v47 = vld [vmem:[#allocation2 + $0x154] ss:$8 sps:$4 sm:$0xff]   ;;  %v970_v48 = vld [vmem:[#allocation2 + $0x150] ss:$8 sps:$4 sm:$0xff]   ;;  %v975_v49 = vld [vmem:[#allocation2 + $0x164] ss:$8 sps:$4 sm:$0xff]  }
  0x36   :  { %v973_v50 = vld [vmem:[#allocation2 + $0x160] ss:$8 sps:$4 sm:$0xff]   ;;  %v978_v51 = vld [vmem:[#allocation2 + $0x174] ss:$8 sps:$4 sm:$0xff]   ;;  %v976_v52 = vld [vmem:[#allocation2 + $0x170] ss:$8 sps:$4 sm:$0xff]  }
  0x37   :  { %v57_v53 = vld [vmem:[%s1181_s0 + $0x10] sm:$0xff]  ;;  %v979_v55 = vld [vmem:[#allocation4 + $0x40] sm:$0xff]   ;;  %v981_v57 = vld [vmem:[#allocation4 + $0x48] sm:$0xff]   ;;  %v112_v8 = vshrl.u32 %v111_v7, 7  ;;  %vm759_vm1 = vcmask 64512  }
  0x38   :  { %370 = vmatpush1.bf16.msra.mxu0 %v921_v9  ;;  %v60_v54 = vpack.c.bf16 %v57_v53, %v57_v53  ;;  %v980_v56 = vld [vmem:[#allocation4] sm:$0xff]   ;;  %841 = vmatprep.subr.bf16.mxu1 %v979_v55  ;;  %v982_v58 = vld [vmem:[#allocation4 + $0x8] sm:$0xff]   ;;  %v983_v59 = vld [vmem:[#allocation4 + $0x50] sm:$0xff]  }
  0x39   :  { %371 = vmatprep.subr.bf16.mxu0 %v922_v10  ;;  %842 = vmatpush3.bf16.msra.mxu1 %v980_v56  ;;  %v984_v60 = vld [vmem:[#allocation4 + $0x10] sm:$0xff]   ;;  %v985_v61 = vld [vmem:[#allocation4 + $0x58] sm:$0xff]   ;;  %v987_v63 = vld [vmem:[#allocation4 + $0x60] sm:$0xff]   ;;  %v113_v9 = vsub.s32 0, %v112_v8 }
  0x3a   :  { %843 = vmatprep.subr.bf16.mxu1 %v981_v57  ;;  %v986_v62 = vld [vmem:[#allocation4 + $0x18] sm:$0xff]   ;;  %v988_v0 = vld [vmem:[#allocation4 + $0x20] sm:$0xff]   ;;  %v989_v1 = vld [vmem:[#allocation4 + $0x68] sm:$0xff]  }
  0x3b   :  { %v990_v2 = vld [vmem:[#allocation4 + $0x28] sm:$0xff]   ;;  %v991_v3 = vld [vmem:[#allocation4 + $0x70] sm:$0xff]   ;;  %v993_v5 = vld [vmem:[#allocation4 + $0x78] sm:$0xff]  }
  0x3c   :  { %372 = vmatpush1.bf16.msra.mxu0 %v924_v11  ;;  %v992_v4 = vld [vmem:[#allocation4 + $0x30] sm:$0xff]   ;;  %v994_v6 = vld [vmem:[#allocation4 + $0x38] sm:$0xff]   ;;  %v109_v10 = vld [vmem:[%s1183_s2] sm:$0x3]  ;;  %v117_v11 = vsub.s32 1, %v112_v8 }
  0x3d   :  { %373 = vmatprep.subr.bf16.mxu0 %v925_v12  ;;  %844 = vmatpush3.bf16.msra.mxu1 %v982_v58  ;;  %v114_v12 = vrot.slane %v109_v10, %v113_v9 }
  0x3e   :  { %845 = vmatprep.subr.bf16.mxu1 %v983_v59  ;;  %v118_v13 = vrot.slane %v109_v10, %v117_v11 }
  0x40   :  { %374 = vmatpush1.bf16.msra.mxu0 %v927_v15 }
  0x41   :  { %375 = vmatprep.subr.bf16.mxu0 %v928_v16  ;;  %846 = vmatpush3.bf16.msra.mxu1 %v984_v60 }
  0x42   :  { %847 = vmatprep.subr.bf16.mxu1 %v985_v61 }
  0x44   :  { %376 = vmatpush1.bf16.msra.mxu0 %v930_v17 }
  0x45   :  { %377 = vmatprep.subr.bf16.mxu0 %v931_v18  ;;  %848 = vmatpush3.bf16.msra.mxu1 %v986_v62 }
  0x46   :  { %849 = vmatprep.subr.bf16.mxu1 %v987_v63 }
  0x48   :  { %378 = vmatpush1.bf16.msra.mxu0 %v933_v19 }
  0x49   :  { %379 = vmatprep.subr.bf16.mxu0 %v934_v20  ;;  %850 = vmatpush3.bf16.msra.mxu1 %v988_v0 }
  0x4a   :  { %851 = vmatprep.subr.bf16.mxu1 %v989_v1 }
  0x4c   :  { %380 = vmatpush1.bf16.msra.mxu0 %v936_v21 }
  0x4d   :  { %381 = vmatprep.subr.bf16.mxu0 %v937_v22  ;;  %852 = vmatpush3.bf16.msra.mxu1 %v990_v2  ;;  %v832_v2 = vld [vmem:[%s1187_s6] ss:$0 sm:$0xff] }
  0x4e   :  { %853 = vmatprep.subr.bf16.mxu1 %v991_v3 }
  0x50   :  { %382 = vmatpush1.bf16.msra.mxu0 %v939_v23 }
  0x51   :  { %383 = vmatprep.subr.bf16.mxu0 %v940_v24  ;;  %854 = vmatpush3.bf16.msra.mxu1 %v992_v4 }
  0x52   :  { %855 = vmatprep.subr.bf16.mxu1 %v993_v5 }
  0x54   :  { %384 = vmatpush1.bf16.msra.mxu0 %v942_v25 }
  0x55   :  { %385 = vmatprep.subr.bf16.mxu0 %v943_v26  ;;  %856 = vmatpush3.bf16.msra.mxu1 %v994_v6 }
  0x58   :  { %386 = vmatpush1.bf16.msra.mxu0 %v945_v27 }
  0x59   :  { %387 = vmatprep.subr.bf16.mxu0 %v946_v28 }
  0x5c   :  { %388 = vmatpush1.bf16.msra.mxu0 %v948_v29 }
  0x5d   :  { %389 = vmatprep.subr.bf16.mxu0 %v949_v30 }
  0x60   :  { %390 = vmatpush1.bf16.msra.mxu0 %v951_v31 }
  0x61   :  { %391 = vmatprep.subr.bf16.mxu0 %v952_v32 }
  0x64   :  { %392 = vmatpush1.bf16.msra.mxu0 %v954_v33 }
  0x65   :  { %402 = vmatprep.subr.bf16.mxu0 %v957_v35 }
  0x67   :  { %394 = vmatmul.mubr.bf16.vlgmr.msra.gmra.mrb[0].mxu0 %v58_v36 }
  0x68   :  { %403 = vmatpush1.bf16.msra.mxu0 %v955_v37  ;;  %434 = vmatprep.mubr.bf16.mxu0 %v1069_v40  ;;  %v995_v40 = vld [vmem:[%s1186_s5] sm:$0xff]  }
  0x69   :  { %404 = vmatprep.subr.bf16.mxu0 %v960_v38 }
  0x6c   :  { %405 = vmatpush1.bf16.msra.mxu0 %v958_v39 }
  0x6d   :  { %406 = vmatprep.subr.bf16.mxu0 %v963_v41  ;;  %v1070_v41 = vmov 0.0  }
  0x6e   :  { %872 = vmatprep.subr.bf16.mxu1 %v1070_v41 }
  0x70   :  { %407 = vmatpush1.bf16.msra.mxu0 %v961_v42  ;;  %v996_v42 = vld [vmem:[%s1186_s5 + $0x8] sm:$0xff]  }
  0x71   :  { %408 = vmatprep.subr.bf16.mxu0 %v966_v43  ;;  %v997_v43 = vld [vmem:[%s1186_s5 + $0x10] sm:$0xff]  }
  0x74   :  { %409 = vmatpush1.bf16.msra.mxu0 %v964_v44  ;;  %v998_v44 = vld [vmem:[%s1186_s5 + $0x18] sm:$0xff]  }
  0x75   :  { %410 = vmatprep.subr.bf16.mxu0 %v969_v45  ;;  %v999_v45 = vld [vmem:[%s1186_s5 + $0x20] sm:$0xff]  }
  0x78   :  { %411 = vmatpush1.bf16.msra.mxu0 %v967_v46  ;;  %v1000_v46 = vld [vmem:[%s1186_s5 + $0x28] sm:$0xff]  }
  0x79   :  { %412 = vmatprep.subr.bf16.mxu0 %v972_v47  ;;  %v1001_v47 = vld [vmem:[%s1186_s5 + $0x30] sm:$0xff]  }
  0x7c   :  { %413 = vmatpush1.bf16.msra.mxu0 %v970_v48  ;;  %v1002_v48 = vld [vmem:[%s1186_s5 + $0x38] sm:$0xff]  }
  0x7d   :  { %414 = vmatprep.subr.bf16.mxu0 %v975_v49 }
  0x80   :  { %415 = vmatpush1.bf16.msra.mxu0 %v973_v50  ;;  %v815_v50 = vld [vmem:[%s1185_s4] ss:$0 sm:$0xff] }
  0x81   :  { %416 = vmatprep.subr.bf16.mxu0 %v978_v51 }
  0x84   :  { %417 = vmatpush1.bf16.msra.mxu0 %v976_v52 }
  0x87   :  { %435 = vmatmul.mubr.bf16.vlgmr.msra.gmra.mrb[0].mxu0 %v60_v54 }
 0x15a   :  { %v436_v14 = vpop.f32.mrb[0].mxu0 }
 0x15b   :  { %v892_v15 = vadd.f32 %v436_v14, %v114_v12  ;;  %v438_v16 = vpop.f32.mrb[1].mxu0 }
 0x15c   :  { %v893_v17 = vadd.f32 %v438_v16, %v118_v13  ;;  %v440_v18 = vpop.f32.mrb[2].mxu0 }
 0x15d   :  { %v443_v19 = vmin.f32 %v892_v15, 20.0  ;;  %v441_v20 = vpop.f32.mrb[3].mxu0 }
 0x15e   :  { %v444_v21 = vmin.f32 %v893_v17, 20.0 }
 0x15f   :  { %v445_v22 = vmul.f32 1.442695, %v443_v19 }
 0x160   :  { %v447_v23 = vmul.f32 1.442695, %v444_v21 }
 0x161   :  { %1003 = vpow2.f32 %v445_v22 }
 0x162   :  { %1005 = vpow2.f32 %v447_v23 }
 0x16b   :  { %v1004_v24 = vpop.eup %1003 }
 0x16c   :  { %v1006_v25 = vpop.eup %1005  ;;  %v449_v26 = vadd.f32 2.0, %v1004_v24 }
 0x16d   :  { %v450_v27 = vadd.f32 2.0, %v1006_v25 }
 0x16e   :  { %v451_v28 = vmul.f32 %v1004_v24, %v449_v26 }
 0x16f   :  { %v452_v29 = vmul.f32 %v1006_v25, %v450_v27 }
 0x170   :  { %v453_v30 = vadd.f32 2.0, %v451_v28 }
 0x171   :  { %v454_v31 = vadd.f32 2.0, %v452_v29 }
 0x172   :  { %1007 = vrcp.f32 %v453_v30 }
 0x173   :  { %1009 = vrcp.f32 %v454_v31 }
 0x17c   :  { %v1008_v32 = vpop.eup %1007 }
 0x17d   :  { %v1010_v33 = vpop.eup %1009  ;;  %v456_v34 = vmul.f32 %v1008_v32, %v451_v28 }
 0x17e   :  { %v458_v35 = vmul.f32 %v1010_v33, %v452_v29 }
 0x17f   :  { %v459_v36 = vmul.f32 %v892_v15, %v456_v34 }
 0x180   :  { %v460_v37 = vmul.f32 %v893_v17, %v458_v35 }
 0x181   :  { %v461_v39 = vpack.c.bf16 %v459_v36, %v459_v36 }
 0x182   :  { %v462_v38 = vpack.c.bf16 %v460_v37, %v460_v37 }
 0x184   :  { %630 = vmatprep.mubr.bf16.mxu1 %v462_v38 }
 0x185   :  { %631 = vmatmul.mubr.bf16.vlgmr.msra.gmra.mrb[0].mxu1 %v461_v39 }
 0x186   :  { %873 = vmatpush3.bf16.msra.mxu1 %v995_v40  ;;  %888 = vmatprep.mubr.msk.bf16.mxu1 %vm1071_vm0, %v1070_v41 }
 0x187   :  { %874 = vmatprep.subr.bf16.mxu1 %v1070_v41 }
 0x18a   :  { %875 = vmatpush3.bf16.msra.mxu1 %v996_v42 }
 0x18b   :  { %876 = vmatprep.subr.bf16.mxu1 %v1070_v41 }
 0x18e   :  { %877 = vmatpush3.bf16.msra.mxu1 %v997_v43 }
 0x18f   :  { %878 = vmatprep.subr.bf16.mxu1 %v1070_v41 }
 0x192   :  { %879 = vmatpush3.bf16.msra.mxu1 %v998_v44 }
 0x193   :  { %880 = vmatprep.subr.bf16.mxu1 %v1070_v41 }
 0x196   :  { %881 = vmatpush3.bf16.msra.mxu1 %v999_v45 }
 0x197   :  { %882 = vmatprep.subr.bf16.mxu1 %v1070_v41 }
 0x19a   :  { %883 = vmatpush3.bf16.msra.mxu1 %v1000_v46 }
 0x19b   :  { %884 = vmatprep.subr.bf16.mxu1 %v1070_v41 }
 0x19e   :  { %885 = vmatpush3.bf16.msra.mxu1 %v1001_v47 }
 0x19f   :  { %886 = vmatprep.subr.bf16.mxu1 %v1070_v41 }
 0x1a2   :  { %887 = vmatpush3.bf16.msra.mxu1 %v1002_v48 }
 0x258   :  { %v857_v49 = vpop.f32.mrb[0].mxu1 }
 0x259   :  { %v858_v51 = vpop.f32.mrb[1].mxu1 }
 0x25a   :  { %v859_v52 = vadd.f32 %v858_v51, %v857_v49  ;;  %v860_v53 = vpop.f32.mrb[2].mxu1 }
 0x25b   :  { %v861_v54 = vpop.f32.mrb[3].mxu1 }
 0x25c   :  { %v633_v55 = vadd.f32 %v859_v52, %v815_v50 }
 0x25e   :  { %v638_v56 = vmin.f32 %v633_v55, 20.0 }
 0x260   :  { %v639_v57 = vmul.f32 1.442695, %v638_v56 }
 0x262   :  { %1011 = vpow2.f32 %v639_v57 }
 0x26c   :  { %v1012_v58 = vpop.eup %1011 }
 0x26d   :  { %v641_v59 = vadd.f32 2.0, %v1012_v58 }
 0x26f   :  { %v642_v60 = vmul.f32 %v1012_v58, %v641_v59 }
 0x271   :  { %v643_v61 = vadd.f32 2.0, %v642_v60 }
 0x273   :  { %1013 = vrcp.f32 %v643_v61 }
 0x27d   :  { %v1014_v62 = vpop.eup %1013 }
 0x27e   :  { %v645_v63 = vmul.f32 %v1014_v62, %v642_v60 }
 0x280   :  { %v646_v0 = vmul.f32 %v645_v63, %v633_v55 }
 0x282   :  { %v647_v1 = vpack.c.bf16 %v646_v0, %v646_v0 }
 0x284   :  { %889 = vmatmul.mubr.bf16.vlgmr.msra.gmra.mrb[4].mxu1 %v647_v1 }
 0x357   :  { %v753_v3 = vpop.f32.mrb[4].mxu1 }
 0x358   :  { %v754_v4 = vadd.f32 %v832_v2, %v753_v3  ;;  %v890_v5 = vpop.f32.mrb[5].mxu1 }
 0x359   :  { %v756_v6 = vpop.f32.mrb[6].mxu1 }
 0x35a   :  { %760 = vst.msk [vmem:[%s1188_s7] sm:$0xff] %vm759_vm1, %v754_v4  ;;  %v891_v7 = vpop.f32.mrb[7].mxu1 }
 0x35b   :  { %765 = vsyncpa [#allocation3], 1 }
 0x35c   :  { %766 = vsyncpa [#allocation5], 1 }

</bundles_post_ra>
